<compile_context>
chip_gen: v6e
topology: v6e:2x2x1
jax: 0.10.0
libtpu: 0.0.40
codegen_flags: <defaults>
</compile_context>

<pallas_src>
import functools

import jax
import jax.numpy as jnp
from jax.experimental import pallas as pl
from jax.experimental.pallas import tpu as pltpu


def _round_up(n, m):
    return ((n + m - 1) // m) * m


def _vmem_limit_bytes():
    """Generation-aware VMEM budget (trace-time host query, safe fallback)."""
    try:
        cap = pltpu.get_tpu_info().vmem_capacity_bytes
        return min(int(0.75 * cap), 100 * 1024 * 1024)
    except Exception:
        return 48 * 1024 * 1024  # safe on every generation (v7x has 64 MiB)


def nade_kernel(x_ref, w1_ref, c_ref, w2_ref, b_ref, out_ref, *, approx_sigmoid):
    """Fused NADE forward on one batch tile (all feature dims lane-padded).

    x_ref : (TB, XP)   activations (f32 or bf16), XP = round_up(x_dim, 128)
    w1_ref: (XP, HP)   pre-masked, pre-transposed (W_hx*mask).T, zero-padded
    c_ref : (1, HP)    f32 bias (zero-padded)
    w2_ref: (HP, XP)   pre-masked, pre-transposed (W_xh*mask).T, zero-padded
    b_ref : (1, XP)    f32 bias (zero-padded)
    out_ref:(TB, XP)   logits (f32 or bf16)
    """
    x = x_ref[...]

    # Layer 1: MXU matmul with f32 accumulation; bias in f32.
    z = jnp.dot(x, w1_ref[...], preferred_element_type=jnp.float32) + c_ref[...]

    if approx_sigmoid:
        # sigmoid(z) = 1 / (1 + exp(-z)): exp and approx reciprocal both run on
        # the EUP slot, which is otherwise idle next to the MXU.
        e = jnp.exp(-z)
        h = pl.reciprocal(1.0 + e, approx=True)
    else:
        h = jax.nn.sigmoid(z)

    # Layer 2: cast activations to the weight dtype only at the dot.
    p = jnp.dot(h.astype(w2_ref.dtype), w2_ref[...],
                preferred_element_type=jnp.float32) + b_ref[...]
    out_ref[...] = p.astype(out_ref.dtype)


@functools.partial(jax.jit,
                   static_argnames=("compute_dtype", "out_dtype", "approx_sigmoid"))
def nade_forward(inputs, W_hx, mask_W_hx, c, W_xh, mask_W_xh, b, *,
                 compute_dtype=jnp.bfloat16, out_dtype=jnp.float32,
                 approx_sigmoid=True):
    B, x_dim = inputs.shape
    hid_dim = W_hx.shape[0]

    # ---- Lane-dense padded feature sizes (multiples of 128) ----------------
    xp = _round_up(x_dim, 128)
    hp = _round_up(hid_dim, 128)

    # ---- Wrapper-side prep (paid once, outside the kernel) -----------------
    # Pre-mask + pre-transpose, then zero-pad to lane-dense shapes.
    w1 = jnp.pad((W_hx * mask_W_hx).T,
                 ((0, xp - x_dim), (0, hp - hid_dim))).astype(compute_dtype)
    w2 = jnp.pad((W_xh * mask_W_xh).T,
                 ((0, hp - hid_dim), (0, xp - x_dim))).astype(compute_dtype)
    c2 = jnp.pad(c.reshape(1, hid_dim),
                 ((0, 0), (0, hp - hid_dim))).astype(jnp.float32)
    b2 = jnp.pad(b.reshape(1, x_dim),
                 ((0, 0), (0, xp - x_dim))).astype(jnp.float32)

    # ---- Batch tiling: ~4 MiB streamed tiles, explicit pad-and-slice -------
    itemsize = jnp.dtype(compute_dtype).itemsize
    tb_target = _round_up(max(256, (4 * 1024 * 1024) // (xp * itemsize)), 8)
    b8 = _round_up(B, 8)
    n_blocks = max(1, pl.cdiv(b8, tb_target))
    if n_blocks == 1 and b8 >= 2048:
        # Guarantee >=2 grid steps so the "parallel" axis can shard across
        # both TensorCores on v7x.
        n_blocks = 2
    tb = _round_up(pl.cdiv(b8, n_blocks), 8)
    bp = n_blocks * tb  # padded batch: every block is full (no OOB reads)

    x = jnp.pad(inputs, ((0, bp - B), (0, xp - x_dim))).astype(compute_dtype)

    # Weights/biases use constant index_maps -> fetched once and kept resident
    # in VMEM across the batch grid; only activation tiles stream
    # (double-buffered by Pallas).
    grid_spec = pltpu.PrefetchScalarGridSpec(
        num_scalar_prefetch=0,
        grid=(n_blocks,),
        in_specs=[
            pl.BlockSpec((tb, xp), lambda i: (i, 0)),   # x  (streamed)
            pl.BlockSpec((xp, hp), lambda i: (0, 0)),   # w1 (resident)
            pl.BlockSpec((1, hp), lambda i: (0, 0)),    # c  (resident)
            pl.BlockSpec((hp, xp), lambda i: (0, 0)),   # w2 (resident)
            pl.BlockSpec((1, xp), lambda i: (0, 0)),    # b  (resident)
        ],
        out_specs=pl.BlockSpec((tb, xp), lambda i: (i, 0)),
    )

    out = pl.pallas_call(
        functools.partial(nade_kernel, approx_sigmoid=approx_sigmoid),
        out_shape=jax.ShapeDtypeStruct((bp, xp), out_dtype),
        grid_spec=grid_spec,
        compiler_params=pltpu.CompilerParams(
            # Batch tiles are independent -> shard across TCs where possible.
            dimension_semantics=("parallel",),
            vmem_limit_bytes=_vmem_limit_bytes(),
        ),
    )(x, w1, c2, w2, b2)

    # Slice off batch / feature padding.
    return out[:B, :x_dim]


if __name__ == "__main__":
    hid_dim, x_dim, batch = 32, 16, 8

    key = jax.random.PRNGKey(0)
    k_whx, k_wxh, k_x = jax.random.split(key, 3)

    # Deterministic parameter init, mirroring the module's __init__ shapes.
    W_hx = jax.random.normal(k_whx, (hid_dim, x_dim), dtype=jnp.float32)
    c = jnp.zeros((hid_dim,), dtype=jnp.float32)
    mask_W_hx = jnp.tril(jnp.ones((hid_dim, x_dim), dtype=jnp.float32), k=-1)

    W_xh = jax.random.normal(k_wxh, (x_dim, hid_dim), dtype=jnp.float32)
    b = jnp.zeros((x_dim,), dtype=jnp.float32)
    mask_W_xh = jnp.tril(jnp.ones((x_dim, hid_dim), dtype=jnp.float32), k=0)

    # Binary-ish inputs, as NADE expects.
    inputs = (jax.random.uniform(k_x, (batch, x_dim)) > 0.5).astype(jnp.float32)

    # Pure-JAX f32 reference (matches the PyTorch forward).
    h_ref = jax.nn.sigmoid(inputs @ (W_hx * mask_W_hx).T + c)
    p_ref = h_ref @ (W_xh * mask_W_xh).T + b

    # Exact f32 path: f32 operands + exact sigmoid -> bit-level check.
    out_f32 = nade_forward(inputs, W_hx, mask_W_hx, c, W_xh, mask_W_xh, b,
                           compute_dtype=jnp.float32, out_dtype=jnp.float32,
                           approx_sigmoid=False)
    out_f32 = jax.block_until_ready(out_f32)
    assert out_f32.shape == (batch, x_dim)
    assert jnp.allclose(out_f32, p_ref, atol=1e-5, rtol=1e-5)

    # Fast path: bf16 matmul operands + approx sigmoid + bf16 logits.
    # Compare against a bf16-operand reference (tighter than comparing to f32).
    w1_bf = (W_hx * mask_W_hx).T.astype(jnp.bfloat16)
    w2_bf = (W_xh * mask_W_xh).T.astype(jnp.bfloat16)
    h_bf = jax.nn.sigmoid(
        jnp.dot(inputs.astype(jnp.bfloat16), w1_bf,
                preferred_element_type=jnp.float32) + c)
    p_bf_ref = jnp.dot(h_bf.astype(jnp.bfloat16), w2_bf,
                       preferred_element_type=jnp.float32) + b

    out_fast = nade_forward(inputs, W_hx, mask_W_hx, c, W_xh, mask_W_xh, b,
                            compute_dtype=jnp.bfloat16, out_dtype=jnp.bfloat16,
                            approx_sigmoid=True)
    out_fast = jax.block_until_ready(out_fast)
    assert out_fast.shape == (batch, x_dim)
    assert jnp.allclose(out_fast.astype(jnp.float32), p_bf_ref,
                        atol=1e-1, rtol=1e-1)

    print("KERNEL_OK")
</pallas_src>

<mosaic_0001>
module attributes {stable_mosaic.version = 11 : i64} {
  func.func @nade_kernel(%arg0: i32, %arg1: memref<8x128xf32, #tpu.memory_space<vmem>>, %arg2: memref<128x128xf32, #tpu.memory_space<vmem>>, %arg3: memref<1x128xf32, #tpu.memory_space<vmem>>, %arg4: memref<128x128xf32, #tpu.memory_space<vmem>>, %arg5: memref<1x128xf32, #tpu.memory_space<vmem>>, %arg6: memref<8x128xf32, #tpu.memory_space<vmem>>) attributes {dimension_semantics = [#tpu.dimension_semantics<parallel>], iteration_bounds = array<i64: 1>, scalar_prefetch = 0 : i64, scratch_operands = 0 : i64, tpu.core_type = #tpu.core_type<tc>, window_params = [{transform_indices = @transform_0, window_bounds = array<i64: 8, 128>}, {pipeline_mode = #tpu.pipeline_mode<synchronous>, transform_indices = @transform_1, window_bounds = array<i64: 128, 128>}, {pipeline_mode = #tpu.pipeline_mode<synchronous>, transform_indices = @transform_2, window_bounds = array<i64: 1, 128>}, {pipeline_mode = #tpu.pipeline_mode<synchronous>, transform_indices = @transform_3, window_bounds = array<i64: 128, 128>}, {pipeline_mode = #tpu.pipeline_mode<synchronous>, transform_indices = @transform_4, window_bounds = array<i64: 1, 128>}, {transform_indices = @transform_5, window_bounds = array<i64: 8, 128>}]} {
    %c0 = arith.constant 0 : index
    %c0_0 = arith.constant 0 : index
    %0 = vector.load %arg1[%c0, %c0_0] : memref<8x128xf32, #tpu.memory_space<vmem>>, vector<8x128xf32>
    %c0_1 = arith.constant 0 : index
    %c0_2 = arith.constant 0 : index
    %1 = vector.load %arg2[%c0_1, %c0_2] : memref<128x128xf32, #tpu.memory_space<vmem>>, vector<128x128xf32>
    %cst = arith.constant dense<0.000000e+00> : vector<8x128xf32>
    %2 = tpu.matmul %0, %1, %cst {dimension_numbers = #tpu.dot_dimension_numbers<[1], [0], [0], [1], [0, 0, 1, 1], [], []>} : vector<8x128xf32>, vector<128x128xf32>, vector<8x128xf32> -> vector<8x128xf32>
    %c0_3 = arith.constant 0 : index
    %c0_4 = arith.constant 0 : index
    %3 = vector.load %arg3[%c0_3, %c0_4] : memref<1x128xf32, #tpu.memory_space<vmem>>, vector<1x128xf32>
    %4 = vector.broadcast %3 : vector<1x128xf32> to vector<8x128xf32>
    %5 = arith.addf %2, %4 : vector<8x128xf32>
    %6 = arith.negf %5 : vector<8x128xf32>
    %7 = math.exp %6 : vector<8x128xf32>
    %cst_5 = arith.constant 1.000000e+00 : f32
    %8 = vector.broadcast %cst_5 : f32 to vector<8x128xf32>
    %9 = arith.addf %8, %7 : vector<8x128xf32>
    %10 = arith.divf %8, %9 : vector<8x128xf32>
    %c0_6 = arith.constant 0 : index
    %c0_7 = arith.constant 0 : index
    %11 = vector.load %arg4[%c0_6, %c0_7] : memref<128x128xf32, #tpu.memory_space<vmem>>, vector<128x128xf32>
    %cst_8 = arith.constant dense<0.000000e+00> : vector<8x128xf32>
    %12 = tpu.matmul %10, %11, %cst_8 {dimension_numbers = #tpu.dot_dimension_numbers<[1], [0], [0], [1], [0, 0, 1, 1], [], []>} : vector<8x128xf32>, vector<128x128xf32>, vector<8x128xf32> -> vector<8x128xf32>
    %c0_9 = arith.constant 0 : index
    %c0_10 = arith.constant 0 : index
    %13 = vector.load %arg5[%c0_9, %c0_10] : memref<1x128xf32, #tpu.memory_space<vmem>>, vector<1x128xf32>
    %14 = vector.broadcast %13 : vector<1x128xf32> to vector<8x128xf32>
    %15 = arith.addf %12, %14 : vector<8x128xf32>
    %c0_11 = arith.constant 0 : index
    %c0_12 = arith.constant 0 : index
    %16 = vector.load %arg6[%c0_11, %c0_12] : memref<8x128xf32, #tpu.memory_space<vmem>>, vector<8x128xf32>
    tpu.vector_store %arg6[%c0_11, %c0_12], %15 {strides = array<i32>} : memref<8x128xf32, #tpu.memory_space<vmem>>, vector<8x128xf32>,
    return
  }
  func.func @transform_0(%arg0: i32) -> (i32, i32) {
    %c0_i32 = arith.constant 0 : i32
    %c0_i32_0 = arith.constant 0 : i32
    return %arg0, %c0_i32 : i32, i32
  }
  func.func @transform_1(%arg0: i32) -> (i32, i32) {
    %c0_i32 = arith.constant 0 : i32
    %c0_i32_0 = arith.constant 0 : i32
    %c0_i32_1 = arith.constant 0 : i32
    return %c0_i32, %c0_i32_0 : i32, i32
  }
  func.func @transform_2(%arg0: i32) -> (i32, i32) {
    %c0_i32 = arith.constant 0 : i32
    %c0_i32_0 = arith.constant 0 : i32
    %c0_i32_1 = arith.constant 0 : i32
    return %c0_i32, %c0_i32_0 : i32, i32
  }
  func.func @transform_3(%arg0: i32) -> (i32, i32) {
    %c0_i32 = arith.constant 0 : i32
    %c0_i32_0 = arith.constant 0 : i32
    %c0_i32_1 = arith.constant 0 : i32
    return %c0_i32, %c0_i32_0 : i32, i32
  }
  func.func @transform_4(%arg0: i32) -> (i32, i32) {
    %c0_i32 = arith.constant 0 : i32
    %c0_i32_0 = arith.constant 0 : i32
    %c0_i32_1 = arith.constant 0 : i32
    return %c0_i32, %c0_i32_0 : i32, i32
  }
  func.func @transform_5(%arg0: i32) -> (i32, i32) {
    %c0_i32 = arith.constant 0 : i32
    %c0_i32_0 = arith.constant 0 : i32
    return %arg0, %c0_i32 : i32, i32
  }
}

</mosaic_0001>

<bundles_post_ra>
// kernel: mul.3
= control target key start
LH: loop header
LB: loop body
LE: loop exit
PB: predicated region body
PF: predicated region fallthrough
CT: control target
= control target key end

     0   :  { %3 = vsyncpa [#allocation1], 0  ;;  %s126_s0 = inlined_call_operand.hbm [shape: f32[16,32], index: 0, kind: input, shape index: {}]   ;;  %s127_s1 = inlined_call_operand.hbm [shape: f32[16,32], index: 1, kind: input, shape index: {}]   ;;  %s128_s2 = inlined_call_operand.vmem [shape: f32[16,32], index: 2, kind: output, shape index: {}]  }
   0x1   :  { %4 = vsyncpa [#allocation3], 0  ;;  %s95_s9 = smov [#allocation0]  }
   0x2   :  { %s8_s10 = sshll.u32 %s95_s9, 4  ;;  %s9_s10 = int_to_ptr.vmem [resolvable:$true] %s8_s10 }
   0x3   :  { %s59_s11 = scalar_lea.vmem %s9_s10, 256  ;;  %p64_p1 = scmp.lt.s32.totalorder %s9_s10, %s9_s10 }
   0x4   :  { %p60_p0 = scmp.ne.s32.totalorder %s9_s10, %s59_s11  ;;  %p65_p2 = scmp.lt.s32.totalorder %s59_s11, %s59_s11 }
   0x6   :  { %p66_p3 = por %p65_p2, %p64_p1 }
   0x8   :  { %p67_p4 = pnand %p66_p3, %p60_p0 }
   0xa   :  { %70 = shalt.err (!%p67_p4)
}
   0xb   :  { %s96_s12 = smov 128   ;;  %s97_s13 = smov 8  }
   0xc   :  { %14 = dma.hbm_to_vmem [thread:$0]  %s126_s0, 256, %s9_s10, [#allocation1], %s96_s12, %s96_s12, %s97_s13  }
   0xd   :  { %s98_s0 = smov [#allocation2]  }
   0xe   :  { %s18_s16 = sshll.u32 %s98_s0, 4  ;;  %s19_s16 = int_to_ptr.vmem [resolvable:$true] %s18_s16 }
   0xf   :  { %s79_s17 = scalar_lea.vmem %s19_s16, 256  ;;  %p84_p6 = scmp.lt.s32.totalorder %s19_s16, %s19_s16 }
  0x10   :  { %p80_p5 = scmp.ne.s32.totalorder %s19_s16, %s79_s17  ;;  %p85_p7 = scmp.lt.s32.totalorder %s79_s17, %s79_s17 }
  0x12   :  { %p86_p8 = por %p85_p7, %p84_p6 }
  0x14   :  { %p87_p9 = pnand %p86_p8, %p80_p5 }
  0x16   :  { %90 = shalt.err (!%p87_p9)
}
  0x17   :  { %24 = dma.hbm_to_vmem [thread:$0]  %s127_s1, 256, %s19_s16, [#allocation3], %s96_s12, %s96_s12, %s97_s13  }
  0x18   :  { %91 = dma.done.wait [#allocation1], 256  }
  0x19   :  { %92 = vsyncadd [#allocation1], 4294967040 }
  0x1a   :  { %93 = dma.done.wait [#allocation3], 256  }
  0x1b   :  { %94 = vsyncadd [#allocation3], 4294967040  ;;  %v27_v0 = vld [vmem:[#allocation0] sm:$0xff]  ;;  %v28_v1 = vld [vmem:[#allocation2] sm:$0xff] }
  0x1c   :  { %v35_v2 = vld [vmem:[#allocation0 + $0x8] sm:$0xff]  ;;  %v31_v3 = vmul.f32 %v28_v1, %v27_v0  ;;  %v37_v4 = vld [vmem:[#allocation2 + $0x8] sm:$0xff] }
  0x1d   :  { %v40_v5 = vmul.f32 %v37_v4, %v35_v2 }
  0x1e   :  { %33 = vst [vmem:[%s128_s2] sm:$0xff] %v31_v3 }
  0x1f   :  { %46 = vst [vmem:[%s128_s2 + $0x8] sm:$0xff] %v40_v5 }
  0x20   :  { %44 = vsyncpa [#allocation1], 1 }
  0x21   :  { %45 = vsyncpa [#allocation3], 1 }

// kernel: nade_forward.1
= control target key start
LH: loop header
LB: loop body
LE: loop exit
PB: predicated region body
PF: predicated region fallthrough
CT: control target
= control target key end

     0   :  { %v365_v1 = vmov 0.0   ;;  %vm366_vm0 = vmmov 0   ;;  %s540_s0 = inlined_call_operand.vmem [shape: f32[8,128], index: 0, kind: input, shape index: {}]   ;;  %s541_s1 = inlined_call_operand.vmem [shape: f32[128,128], index: 1, kind: input, shape index: {}]   ;;  %s542_s2 = inlined_call_operand.vmem [shape: f32[1,128], index: 2, kind: input, shape index: {}]   ;;  %s543_s3 = inlined_call_operand.vmem [shape: f32[128,128], index: 3, kind: input, shape index: {}]   ;;  %s544_s4 = inlined_call_operand.vmem [shape: f32[1,128], index: 4, kind: input, shape index: {}]   ;;  %s545_s5 = inlined_call_operand.hbm [shape: f32[8,128], index: 5, kind: output, shape index: {}]  }
   0x1   :  { %v37_v0 = vld [vmem:[%s541_s1 + $0x78] sm:$0xff]  ;;  %266 = vmatprep.subr.mxu0 %v365_v1  ;;  %v36_v2 = vld [vmem:[%s541_s1 + $0x70] sm:$0xff]  ;;  %298 = vmatprep.mubr.msk.f32.mxu0 %vm366_vm0, %v365_v1  ;;  %v35_v3 = vld [vmem:[%s541_s1 + $0x68] sm:$0xff] }
   0x2   :  { %267 = vmatpush3.msra.mxu0 %v37_v0  ;;  %301 = vmatprep.subr.mxu1 %v365_v1  ;;  %v34_v4 = vld [vmem:[%s541_s1 + $0x60] sm:$0xff] }
   0x3   :  { %268 = vmatprep.subr.mxu0 %v365_v1  ;;  %333 = vmatprep.mubr.msk.f32.mxu1 %vm366_vm0, %v365_v1 }
   0x4   :  { %269 = vmatpush3.msra.mxu0 %v36_v2 }
   0x5   :  { %270 = vmatprep.subr.mxu0 %v365_v1 }
   0x6   :  { %271 = vmatpush3.msra.mxu0 %v35_v3 }
   0x7   :  { %10 = vsyncpa [#allocation3], 0  ;;  %272 = vmatprep.subr.mxu0 %v365_v1  ;;  %v33_v5 = vld [vmem:[%s541_s1 + $0x58] sm:$0xff]  ;;  %v32_v6 = vld [vmem:[%s541_s1 + $0x50] sm:$0xff]  ;;  %s367_s8 = smov [#allocation2]  }
   0x8   :  { %273 = vmatpush3.msra.mxu0 %v34_v4  ;;  %v31_v7 = vld [vmem:[%s541_s1 + $0x48] sm:$0xff]  ;;  %v30_v8 = vld [vmem:[%s541_s1 + $0x40] sm:$0xff]  ;;  %v29_v9 = vld [vmem:[%s541_s1 + $0x38] sm:$0xff]  ;;  %s221_s9 = sshll.u32 %s367_s8, 4  ;;  %s222_s9 = int_to_ptr.vmem [resolvable:$true] %s221_s9 }
   0x9   :  { %274 = vmatprep.subr.mxu0 %v365_v1  ;;  %v28_v10 = vld [vmem:[%s541_s1 + $0x30] sm:$0xff]  ;;  %v27_v11 = vld [vmem:[%s541_s1 + $0x28] sm:$0xff]  ;;  %v26_v12 = vld [vmem:[%s541_s1 + $0x20] sm:$0xff]  ;;  %p348_p1 = scmp.lt.s32.totalorder %s222_s9, %s222_s9 }
   0xa   :  { %275 = vmatpush3.msra.mxu0 %v33_v5  ;;  %v25_v13 = vld [vmem:[%s541_s1 + $0x18] sm:$0xff]  ;;  %v24_v14 = vld [vmem:[%s541_s1 + $0x10] sm:$0xff]  ;;  %v23_v15 = vld [vmem:[%s541_s1 + $0x8] sm:$0xff] }
   0xb   :  { %276 = vmatprep.subr.mxu0 %v365_v1  ;;  %v22_v16 = vld [vmem:[%s541_s1] sm:$0xff]  ;;  %v136_v18 = vld [vmem:[%s543_s3 + $0x78] sm:$0xff]  ;;  %v135_v19 = vld [vmem:[%s543_s3 + $0x70] sm:$0xff] }
   0xc   :  { %277 = vmatpush3.msra.mxu0 %v32_v6  ;;  %v21_v17 = vld [vmem:[%s540_s0] sm:$0xff]  ;;  %302 = vmatpush3.msra.mxu1 %v136_v18  ;;  %v134_v20 = vld [vmem:[%s543_s3 + $0x68] sm:$0xff]  ;;  %v132_v22 = vld [vmem:[%s543_s3 + $0x58] sm:$0xff] }
   0xd   :  { %278 = vmatprep.subr.mxu0 %v365_v1  ;;  %303 = vmatprep.subr.mxu1 %v365_v1  ;;  %v133_v21 = vld [vmem:[%s543_s3 + $0x60] sm:$0xff]  ;;  %v131_v23 = vld [vmem:[%s543_s3 + $0x50] sm:$0xff]  ;;  %v130_v24 = vld [vmem:[%s543_s3 + $0x48] sm:$0xff] }
   0xe   :  { %279 = vmatpush3.msra.mxu0 %v31_v7  ;;  %304 = vmatpush3.msra.mxu1 %v135_v19  ;;  %v129_v25 = vld [vmem:[%s543_s3 + $0x40] sm:$0xff]  ;;  %v128_v26 = vld [vmem:[%s543_s3 + $0x38] sm:$0xff]  ;;  %v127_v27 = vld [vmem:[%s543_s3 + $0x30] sm:$0xff] }
   0xf   :  { %280 = vmatprep.subr.mxu0 %v365_v1  ;;  %305 = vmatprep.subr.mxu1 %v365_v1  ;;  %v126_v28 = vld [vmem:[%s543_s3 + $0x28] sm:$0xff]  ;;  %v125_v29 = vld [vmem:[%s543_s3 + $0x20] sm:$0xff]  ;;  %v124_v30 = vld [vmem:[%s543_s3 + $0x18] sm:$0xff] }
  0x10   :  { %281 = vmatpush3.msra.mxu0 %v30_v8  ;;  %306 = vmatpush3.msra.mxu1 %v134_v20  ;;  %v123_v31 = vld [vmem:[%s543_s3 + $0x10] sm:$0xff]  ;;  %v122_v32 = vld [vmem:[%s543_s3 + $0x8] sm:$0xff]  ;;  %v121_v33 = vld [vmem:[%s543_s3] sm:$0xff] }
  0x11   :  { %282 = vmatprep.subr.mxu0 %v365_v1  ;;  %307 = vmatprep.subr.mxu1 %v365_v1  ;;  %v229_v34 = vld [vmem:[%s542_s2] ss:$0 sm:$0xff]  ;;  %s343_s2 = scalar_lea.vmem %s222_s9, 128 }
  0x12   :  { %283 = vmatpush3.msra.mxu0 %v29_v9  ;;  %308 = vmatpush3.msra.mxu1 %v133_v21  ;;  %v231_v42 = vld [vmem:[%s544_s4] ss:$0 sm:$0xff]  ;;  %p344_p0 = scmp.ne.s32.totalorder %s222_s9, %s343_s2  ;;  %p349_p2 = scmp.lt.s32.totalorder %s343_s2, %s343_s2 }
  0x13   :  { %284 = vmatprep.subr.mxu0 %v365_v1  ;;  %309 = vmatprep.subr.mxu1 %v365_v1 }
  0x14   :  { %285 = vmatpush3.msra.mxu0 %v28_v10  ;;  %310 = vmatpush3.msra.mxu1 %v132_v22  ;;  %p350_p3 = por %p349_p2, %p348_p1 }
  0x15   :  { %286 = vmatprep.subr.mxu0 %v365_v1  ;;  %311 = vmatprep.subr.mxu1 %v365_v1 }
  0x16   :  { %287 = vmatpush3.msra.mxu0 %v27_v11  ;;  %312 = vmatpush3.msra.mxu1 %v131_v23  ;;  %p351_p4 = pnand %p350_p3, %p344_p0 }
  0x17   :  { %288 = vmatprep.subr.mxu0 %v365_v1  ;;  %313 = vmatprep.subr.mxu1 %v365_v1 }
  0x18   :  { %289 = vmatpush3.msra.mxu0 %v26_v12  ;;  %314 = vmatpush3.msra.mxu1 %v130_v24 }
  0x19   :  { %290 = vmatprep.subr.mxu0 %v365_v1  ;;  %315 = vmatprep.subr.mxu1 %v365_v1 }
  0x1a   :  { %291 = vmatpush3.msra.mxu0 %v25_v13  ;;  %316 = vmatpush3.msra.mxu1 %v129_v25 }
  0x1b   :  { %292 = vmatprep.subr.mxu0 %v365_v1  ;;  %317 = vmatprep.subr.mxu1 %v365_v1 }
  0x1c   :  { %293 = vmatpush3.msra.mxu0 %v24_v14  ;;  %318 = vmatpush3.msra.mxu1 %v128_v26 }
  0x1d   :  { %294 = vmatprep.subr.mxu0 %v365_v1  ;;  %319 = vmatprep.subr.mxu1 %v365_v1 }
  0x1e   :  { %295 = vmatpush3.msra.mxu0 %v23_v15  ;;  %320 = vmatpush3.msra.mxu1 %v127_v27 }
  0x1f   :  { %296 = vmatprep.subr.mxu0 %v365_v1  ;;  %321 = vmatprep.subr.mxu1 %v365_v1 }
  0x20   :  { %297 = vmatpush3.msra.mxu0 %v22_v16  ;;  %322 = vmatpush3.msra.mxu1 %v126_v28 }
  0x21   :  { %299 = vmatmul.mubr.f32.vlgmr.msra.gmra.mxu0 %v21_v17  ;;  %323 = vmatprep.subr.mxu1 %v365_v1 }
  0x22   :  { %324 = vmatpush3.msra.mxu1 %v125_v29 }
  0x23   :  { %325 = vmatprep.subr.mxu1 %v365_v1 }
  0x24   :  { %326 = vmatpush3.msra.mxu1 %v124_v30 }
  0x25   :  { %327 = vmatprep.subr.mxu1 %v365_v1 }
  0x26   :  { %328 = vmatpush3.msra.mxu1 %v123_v31 }
  0x27   :  { %329 = vmatprep.subr.mxu1 %v365_v1 }
  0x28   :  { %330 = vmatpush3.msra.mxu1 %v122_v32 }
  0x29   :  { %331 = vmatprep.subr.mxu1 %v365_v1 }
  0x2a   :  { %332 = vmatpush3.msra.mxu1 %v121_v33 }
  0xe1   :  { %v111_v35 = vpop.f32.mrf.mxu0 }
  0xe2   :  { %v112_v36 = vadd.f32 %v229_v34, %v111_v35 }
  0xe3   :  { %v300_v37 = vpop.f32.mrf.mxu0 }
  0xe4   :  { %v230_v38 = vmul.f32 -1.442695, %v112_v36 }
  0xe6   :  { %339 = vpow2.f32 %v230_v38 }
  0xf3   :  { %v340_v39 = vpop.eup %339 }
  0xf4   :  { %v118_v40 = vadd.f32 1.0, %v340_v39 }
  0xf6   :  { %341 = vrcp.f32 %v118_v40 }
 0x103   :  { %v342_v41 = vpop.eup %341 }
 0x104   :  { %334 = vmatmul.mubr.f32.vlgmr.msra.gmra.mxu1 %v342_v41 }
 0x1c4   :  { %v210_v43 = vpop.f32.mrf.mxu1 }
 0x1c5   :  { %v211_v44 = vadd.f32 %v231_v42, %v210_v43 }
 0x1c6   :  { %v335_v45 = vpop.f32.mrf.mxu1 }
 0x1c7   :  { %214 = vst [vmem:[#allocation2] sm:$0xff] %v211_v44 }
 0x1c8   :  { %354 = shalt.err (!%p351_p4)
}
 0x1c9   :  { %224 = dma.vmem_to_hbm [thread:$0]  %s222_s9, 128, %s545_s5, [#allocation3]  }
 0x1ca   :  { %363 = dma.done.wait [#allocation3], 128  }
 0x1cb   :  { %364 = vsyncadd [#allocation3], 4294967168 }
 0x1cc   :  { %228 = vsyncpa [#allocation3], 1 }

</bundles_post_ra>
